<compile_context>
chip_gen: v6e
topology: v6e:2x2x1
jax: 0.10.0
libtpu: 0.0.40
codegen_flags: <defaults>
</compile_context>

<pallas_src>
import functools

import jax
import jax.numpy as jnp
from jax import lax
from jax.experimental import pallas as pl
from jax.experimental.pallas import tpu as pltpu


def _model_kernel(x_ref, pk_ref, w2_ref, out_ref):
    B = x_ref.shape[0]
    D = x_ref.shape[2]
    H4 = pk_ref.shape[1]
    H = H4 // 4

    lags = x_ref[:, 0, :]       # (B, D)
    delta = x_ref[:, 1, :]      # (B, D)
    weekday = x_ref[:, 2, :]    # (B, D)

    # Unpack the parameter slab (static slices on a VMEM ref: zero runtime cost).
    # Row layout: [wih (D,4H) | whh (H,4H) | bl (1,4H) | w1 (D,H pad) | b1 (1,H pad)]
    wih = pk_ref[0:D, :]                                   # (D, 4H), gate cols [i,f,o,g]
    whh = pk_ref[D:D + H, :]                               # (H, 4H)
    bl = pk_ref[D + H:D + H + 1, :]                        # (1, 4H)
    w1 = pk_ref[D + H + 1:D + H + 1 + D, 0:H]              # (D, H)
    b1 = pk_ref[D + H + 1 + D:D + H + 2 + D, 0:H]          # (1, H)

    # fc1 (+ dropout, identity at inference)
    fc1_out = jnp.dot(lags, w1, preferred_element_type=jnp.float32) + b1      # (B, H)

    # Input contribution to all LSTM gates for every "time" step; (B, 4H) = one vreg,
    # kept as a value (no scratch store / reload).
    gx = jnp.dot(delta, wih, preferred_element_type=jnp.float32) + bl         # (B, 4H)

    # Fully-unrolled serial recurrence. Hidden states are merged into lstm_h with
    # cheap per-row selects instead of masked dynamic stores to scratch.
    row_ids = lax.broadcasted_iota(jnp.int32, (B, H), 0)
    lstm_h = jnp.zeros((B, H), jnp.float32)
    h = jnp.zeros((1, H), jnp.float32)
    c = jnp.zeros((1, H), jnp.float32)
    for t in range(B):
        # whh is loop-invariant; the unrolled loop lets Mosaic keep it resident.
        gates = gx[t:t + 1, :] + jnp.dot(h, whh, preferred_element_type=jnp.float32)
        sig = jax.nn.sigmoid(gates[:, 0:3 * H])            # gates packed [i, f, o, g]
        i_g = sig[:, 0:H]
        f_g = sig[:, H:2 * H]
        o_g = sig[:, 2 * H:3 * H]
        g_g = jnp.tanh(gates[:, 3 * H:4 * H])
        c = f_g * c + i_g * g_g
        h = o_g * jnp.tanh(c)
        lstm_h = jnp.where(row_ids == t, h, lstm_h)        # write row t (VPU select)

    # fc2 over [fc1_out | lstm_h | weekday] as a split matmul (no lane concat).
    w2a = w2_ref[0:H, :]                                   # (H, 1)
    w2b = w2_ref[H:2 * H, :]                               # (H, 1)
    w2c = w2_ref[2 * H:2 * H + D, :]                       # (D, 1)
    b2 = w2_ref[2 * H + D:2 * H + D + 1, :]                # (1, 1)
    out = (jnp.dot(fc1_out, w2a, preferred_element_type=jnp.float32)
           + jnp.dot(lstm_h, w2b, preferred_element_type=jnp.float32)
           + jnp.dot(weekday, w2c, preferred_element_type=jnp.float32)
           + b2)
    out_ref[...] = out.astype(out_ref.dtype)


@functools.partial(jax.jit, static_argnames=("hidden",))
def model_forward(x, params, hidden):
    B, _, D = x.shape
    H = hidden

    def reorder_gates(m):
        # PyTorch packs gates along the last axis as [i, f, g, o]; reorder to
        # [i, f, o, g] so the kernel does one 3H-wide sigmoid + one H-wide tanh.
        return jnp.concatenate(
            [m[..., 0:H], m[..., H:2 * H], m[..., 3 * H:4 * H], m[..., 2 * H:3 * H]],
            axis=-1)

    def pad_lanes(a):
        return jnp.pad(a, ((0, 0), (0, 4 * H - a.shape[1])))

    # Pack all parameters into 2 buffers (collapses 8 tiny HBM->VMEM DMAs into 2).
    packed = jnp.concatenate(
        [reorder_gates(params["wih"]),
         reorder_gates(params["whh"]),
         reorder_gates(params["bl"]),
         pad_lanes(params["w1"]),
         pad_lanes(params["b1"])], axis=0)                      # (2D + H + 2, 4H)
    w2full = jnp.concatenate([params["w2"], params["b2"]], axis=0)  # (2H + D + 1, 1)

    flops = (2 * B * D * H            # fc1
             + 2 * B * D * 4 * H      # LSTM input gates
             + 2 * B * H * 4 * H      # LSTM recurrence
             + 2 * B * (2 * H + D))   # fc2
    transcendentals = B * 5 * H
    bytes_accessed = 4 * (x.size + packed.size + w2full.size + B)

    vmem = pl.BlockSpec(memory_space=pltpu.MemorySpace.VMEM)
    return pl.pallas_call(
        _model_kernel,
        out_shape=jax.ShapeDtypeStruct((B, 1), jnp.float32),
        in_specs=[vmem, vmem, vmem],
        out_specs=vmem,
        cost_estimate=pl.CostEstimate(flops=flops,
                                      transcendentals=transcendentals,
                                      bytes_accessed=bytes_accessed),
    )(x, packed, w2full)


def make_params(key, input_layer, hidden):
    """Deterministic synthetic parameters (PyTorch-style uniform init bounds)."""
    D, H = input_layer, hidden
    ks = jax.random.split(key, 8)

    def u(k, shape, fan_in):
        bound = 1.0 / jnp.sqrt(jnp.float32(fan_in))
        return jax.random.uniform(k, shape, jnp.float32, -bound, bound)

    # fc1: Linear(D, H)     -> stored transposed as (D, H)
    w1 = u(ks[0], (D, H), D)
    b1 = u(ks[1], (1, H), D)
    # LSTM(D, H): weight_ih (4H, D), weight_hh (4H, H), biases (4H,) each.
    # Stored transposed, PyTorch gate order [i, f, g, o] along the 4H axis.
    wih = u(ks[2], (D, 4 * H), H)
    whh = u(ks[3], (H, 4 * H), H)
    bl = u(ks[4], (1, 4 * H), H) + u(ks[5], (1, 4 * H), H)   # b_ih + b_hh combined
    # fc2: Linear(2H + D, 1) -> stored transposed as (2H + D, 1)
    w2 = u(ks[6], (2 * H + D, 1), 2 * H + D)
    b2 = u(ks[7], (1, 1), 2 * H + D)
    return dict(w1=w1, b1=b1, wih=wih, whh=whh, bl=bl, w2=w2, b2=b2)


def reference_forward(x, params, hidden):
    """Pure-JAX reference mirroring the PyTorch forward (inference mode)."""
    H = hidden
    lags, delta, weekday = x[:, 0, :], x[:, 1, :], x[:, 2, :]
    fc1_out = lags @ params["w1"] + params["b1"]
    gx = delta @ params["wih"] + params["bl"]          # (B, 4H), gate order [i, f, g, o]

    def step(carry, g_t):
        h, c = carry
        gates = g_t[None, :] + h @ params["whh"]
        i = jax.nn.sigmoid(gates[:, 0:H])
        f = jax.nn.sigmoid(gates[:, H:2 * H])
        g = jnp.tanh(gates[:, 2 * H:3 * H])
        o = jax.nn.sigmoid(gates[:, 3 * H:4 * H])
        c = f * c + i * g
        h = o * jnp.tanh(c)
        return (h, c), h[0]

    h0 = jnp.zeros((1, H), jnp.float32)
    c0 = jnp.zeros((1, H), jnp.float32)
    _, hs = lax.scan(step, (h0, c0), gx)               # (B, H)
    ds = jnp.concatenate([fc1_out, hs, weekday], axis=1)
    return ds @ params["w2"] + params["b2"]


if __name__ == "__main__":
    B = 8           # batch size (also the LSTM "sequence length" due to the .view in forward)
    D = 7           # input_layer (must be 7: fc2 expects hidden*2 + 7 features)
    H = 32          # hidden_layer (module default is 50; small value chosen per instructions)

    key = jax.random.PRNGKey(0)
    kx, kp = jax.random.split(key)
    x = jax.random.normal(kx, (B, 3, D), jnp.float32)
    params = make_params(kp, D, H)

    out = model_forward(x, params, H)
    out = jax.block_until_ready(out)

    ref = reference_forward(x, params, H)
    assert out.shape == (B, 1)
    assert jnp.allclose(out, ref, rtol=2e-3, atol=2e-3), "mismatch vs reference"

    print("KERNEL_OK")
</pallas_src>

<mosaic_0001>
module attributes {stable_mosaic.version = 11 : i64} {
  func.func @_model_kernel(%arg0: memref<8x3x7xf32, #tpu.memory_space<vmem>>, %arg1: memref<48x128xf32, #tpu.memory_space<vmem>>, %arg2: memref<72x1xf32, #tpu.memory_space<vmem>>, %arg3: memref<8x1xf32, #tpu.memory_space<vmem>>) attributes {dimension_semantics = [], scalar_prefetch = 0 : i64, scratch_operands = 0 : i64, tpu.core_type = #tpu.core_type<tc>} {
    %c0 = arith.constant 0 : index
    %c0_0 = arith.constant 0 : index
    %c0_1 = arith.constant 0 : index
    %0 = vector.load %arg0[%c0, %c0_0, %c0_1] : memref<8x3x7xf32, #tpu.memory_space<vmem>>, vector<8x1x7xf32>
    %1 = vector.shape_cast %0 : vector<8x1x7xf32> to vector<8x7xf32>
    %c0_2 = arith.constant 0 : index
    %c1 = arith.constant 1 : index
    %c0_3 = arith.constant 0 : index
    %2 = vector.load %arg0[%c0_2, %c1, %c0_3] : memref<8x3x7xf32, #tpu.memory_space<vmem>>, vector<8x1x7xf32>
    %3 = vector.shape_cast %2 : vector<8x1x7xf32> to vector<8x7xf32>
    %c0_4 = arith.constant 0 : index
    %c2 = arith.constant 2 : index
    %c0_5 = arith.constant 0 : index
    %4 = vector.load %arg0[%c0_4, %c2, %c0_5] : memref<8x3x7xf32, #tpu.memory_space<vmem>>, vector<8x1x7xf32>
    %5 = vector.shape_cast %4 : vector<8x1x7xf32> to vector<8x7xf32>
    %c0_6 = arith.constant 0 : index
    %c0_7 = arith.constant 0 : index
    %6 = vector.load %arg1[%c0_6, %c0_7] : memref<48x128xf32, #tpu.memory_space<vmem>>, vector<7x128xf32>
    %c7 = arith.constant 7 : index
    %c0_8 = arith.constant 0 : index
    %7 = vector.load %arg1[%c7, %c0_8] : memref<48x128xf32, #tpu.memory_space<vmem>>, vector<32x128xf32>
    %c39 = arith.constant 39 : index
    %c0_9 = arith.constant 0 : index
    %8 = vector.load %arg1[%c39, %c0_9] : memref<48x128xf32, #tpu.memory_space<vmem>>, vector<1x128xf32>
    %c40 = arith.constant 40 : index
    %c0_10 = arith.constant 0 : index
    %9 = vector.load %arg1[%c40, %c0_10] : memref<48x128xf32, #tpu.memory_space<vmem>>, vector<7x32xf32>
    %c47 = arith.constant 47 : index
    %c0_11 = arith.constant 0 : index
    %10 = vector.load %arg1[%c47, %c0_11] : memref<48x128xf32, #tpu.memory_space<vmem>>, vector<1x32xf32>
    %cst = arith.constant dense<0.000000e+00> : vector<8x32xf32>
    %11 = tpu.matmul %1, %9, %cst {dimension_numbers = #tpu.dot_dimension_numbers<[1], [0], [0], [1], [0, 0, 1, 1], [], []>} : vector<8x7xf32>, vector<7x32xf32>, vector<8x32xf32> -> vector<8x32xf32>
    %12 = vector.broadcast %10 : vector<1x32xf32> to vector<8x32xf32>
    %13 = arith.addf %11, %12 : vector<8x32xf32>
    %cst_12 = arith.constant dense<0.000000e+00> : vector<8x128xf32>
    %14 = tpu.matmul %3, %6, %cst_12 {dimension_numbers = #tpu.dot_dimension_numbers<[1], [0], [0], [1], [0, 0, 1, 1], [], []>} : vector<8x7xf32>, vector<7x128xf32>, vector<8x128xf32> -> vector<8x128xf32>
    %15 = vector.broadcast %8 : vector<1x128xf32> to vector<8x128xf32>
    %16 = arith.addf %14, %15 : vector<8x128xf32>
    %17 = tpu.iota {dimensions = array<i32: 0>} : vector<8x32xi32>
    %cst_13 = arith.constant 0.000000e+00 : f32
    %18 = vector.broadcast %cst_13 : f32 to vector<8x32xf32>
    %cst_14 = arith.constant 0.000000e+00 : f32
    %19 = vector.broadcast %cst_14 : f32 to vector<1x32xf32>
    %cst_15 = arith.constant 0.000000e+00 : f32
    %20 = vector.broadcast %cst_15 : f32 to vector<1x32xf32>
    %21 = vector.extract_strided_slice %16 {offsets = [0, 0], sizes = [1, 128], strides = [1, 1]} : vector<8x128xf32> to vector<1x128xf32>
    %cst_16 = arith.constant dense<0.000000e+00> : vector<1x128xf32>
    %22 = tpu.matmul %19, %7, %cst_16 {dimension_numbers = #tpu.dot_dimension_numbers<[1], [0], [0], [1], [0, 0, 1, 1], [], []>} : vector<1x32xf32>, vector<32x128xf32>, vector<1x128xf32> -> vector<1x128xf32>
    %23 = arith.addf %21, %22 : vector<1x128xf32>
    %24 = vector.extract_strided_slice %23 {offsets = [0, 0], sizes = [1, 96], strides = [1, 1]} : vector<1x128xf32> to vector<1x96xf32>
    %25 = arith.negf %24 : vector<1x96xf32>
    %26 = math.exp %25 : vector<1x96xf32>
    %cst_17 = arith.constant 1.000000e+00 : f32
    %27 = vector.broadcast %cst_17 : f32 to vector<1x96xf32>
    %28 = arith.addf %27, %26 : vector<1x96xf32>
    %29 = arith.divf %27, %28 : vector<1x96xf32>
    %30 = vector.extract_strided_slice %29 {offsets = [0, 0], sizes = [1, 32], strides = [1, 1]} : vector<1x96xf32> to vector<1x32xf32>
    %31 = vector.extract_strided_slice %29 {offsets = [0, 32], sizes = [1, 32], strides = [1, 1]} : vector<1x96xf32> to vector<1x32xf32>
    %32 = vector.extract_strided_slice %29 {offsets = [0, 64], sizes = [1, 32], strides = [1, 1]} : vector<1x96xf32> to vector<1x32xf32>
    %33 = vector.extract_strided_slice %23 {offsets = [0, 96], sizes = [1, 32], strides = [1, 1]} : vector<1x128xf32> to vector<1x32xf32>
    %34 = math.tanh %33 : vector<1x32xf32>
    %35 = arith.mulf %31, %20 : vector<1x32xf32>
    %36 = arith.mulf %30, %34 : vector<1x32xf32>
    %37 = arith.addf %35, %36 : vector<1x32xf32>
    %38 = math.tanh %37 : vector<1x32xf32>
    %39 = arith.mulf %32, %38 : vector<1x32xf32>
    %c0_i32 = arith.constant 0 : i32
    %40 = vector.broadcast %c0_i32 : i32 to vector<8x32xi32>
    %41 = arith.cmpi eq, %17, %40 : vector<8x32xi32>
    %42 = vector.shape_cast %39 : vector<1x32xf32> to vector<1x32xf32>
    %43 = vector.broadcast %42 : vector<1x32xf32> to vector<8x32xf32>
    %44 = arith.select %41, %43, %18 : vector<8x32xi1>, vector<8x32xf32>
    %45 = vector.extract_strided_slice %16 {offsets = [1, 0], sizes = [1, 128], strides = [1, 1]} : vector<8x128xf32> to vector<1x128xf32>
    %cst_18 = arith.constant dense<0.000000e+00> : vector<1x128xf32>
    %46 = tpu.matmul %39, %7, %cst_18 {dimension_numbers = #tpu.dot_dimension_numbers<[1], [0], [0], [1], [0, 0, 1, 1], [], []>} : vector<1x32xf32>, vector<32x128xf32>, vector<1x128xf32> -> vector<1x128xf32>
    %47 = arith.addf %45, %46 : vector<1x128xf32>
    %48 = vector.extract_strided_slice %47 {offsets = [0, 0], sizes = [1, 96], strides = [1, 1]} : vector<1x128xf32> to vector<1x96xf32>
    %49 = arith.negf %48 : vector<1x96xf32>
    %50 = math.exp %49 : vector<1x96xf32>
    %cst_19 = arith.constant 1.000000e+00 : f32
    %51 = vector.broadcast %cst_19 : f32 to vector<1x96xf32>
    %52 = arith.addf %51, %50 : vector<1x96xf32>
    %53 = arith.divf %51, %52 : vector<1x96xf32>
    %54 = vector.extract_strided_slice %53 {offsets = [0, 0], sizes = [1, 32], strides = [1, 1]} : vector<1x96xf32> to vector<1x32xf32>
    %55 = vector.extract_strided_slice %53 {offsets = [0, 32], sizes = [1, 32], strides = [1, 1]} : vector<1x96xf32> to vector<1x32xf32>
    %56 = vector.extract_strided_slice %53 {offsets = [0, 64], sizes = [1, 32], strides = [1, 1]} : vector<1x96xf32> to vector<1x32xf32>
    %57 = vector.extract_strided_slice %47 {offsets = [0, 96], sizes = [1, 32], strides = [1, 1]} : vector<1x128xf32> to vector<1x32xf32>
    %58 = math.tanh %57 : vector<1x32xf32>
    %59 = arith.mulf %55, %37 : vector<1x32xf32>
    %60 = arith.mulf %54, %58 : vector<1x32xf32>
    %61 = arith.addf %59, %60 : vector<1x32xf32>
    %62 = math.tanh %61 : vector<1x32xf32>
    %63 = arith.mulf %56, %62 : vector<1x32xf32>
    %c1_i32 = arith.constant 1 : i32
    %64 = vector.broadcast %c1_i32 : i32 to vector<8x32xi32>
    %65 = arith.cmpi eq, %17, %64 : vector<8x32xi32>
    %66 = vector.shape_cast %63 : vector<1x32xf32> to vector<1x32xf32>
    %67 = vector.broadcast %66 : vector<1x32xf32> to vector<8x32xf32>
    %68 = arith.select %65, %67, %44 : vector<8x32xi1>, vector<8x32xf32>
    %69 = vector.extract_strided_slice %16 {offsets = [2, 0], sizes = [1, 128], strides = [1, 1]} : vector<8x128xf32> to vector<1x128xf32>
    %cst_20 = arith.constant dense<0.000000e+00> : vector<1x128xf32>
    %70 = tpu.matmul %63, %7, %cst_20 {dimension_numbers = #tpu.dot_dimension_numbers<[1], [0], [0], [1], [0, 0, 1, 1], [], []>} : vector<1x32xf32>, vector<32x128xf32>, vector<1x128xf32> -> vector<1x128xf32>
    %71 = arith.addf %69, %70 : vector<1x128xf32>
    %72 = vector.extract_strided_slice %71 {offsets = [0, 0], sizes = [1, 96], strides = [1, 1]} : vector<1x128xf32> to vector<1x96xf32>
    %73 = arith.negf %72 : vector<1x96xf32>
    %74 = math.exp %73 : vector<1x96xf32>
    %cst_21 = arith.constant 1.000000e+00 : f32
    %75 = vector.broadcast %cst_21 : f32 to vector<1x96xf32>
    %76 = arith.addf %75, %74 : vector<1x96xf32>
    %77 = arith.divf %75, %76 : vector<1x96xf32>
    %78 = vector.extract_strided_slice %77 {offsets = [0, 0], sizes = [1, 32], strides = [1, 1]} : vector<1x96xf32> to vector<1x32xf32>
    %79 = vector.extract_strided_slice %77 {offsets = [0, 32], sizes = [1, 32], strides = [1, 1]} : vector<1x96xf32> to vector<1x32xf32>
    %80 = vector.extract_strided_slice %77 {offsets = [0, 64], sizes = [1, 32], strides = [1, 1]} : vector<1x96xf32> to vector<1x32xf32>
    %81 = vector.extract_strided_slice %71 {offsets = [0, 96], sizes = [1, 32], strides = [1, 1]} : vector<1x128xf32> to vector<1x32xf32>
    %82 = math.tanh %81 : vector<1x32xf32>
    %83 = arith.mulf %79, %61 : vector<1x32xf32>
    %84 = arith.mulf %78, %82 : vector<1x32xf32>
    %85 = arith.addf %83, %84 : vector<1x32xf32>
    %86 = math.tanh %85 : vector<1x32xf32>
    %87 = arith.mulf %80, %86 : vector<1x32xf32>
    %c2_i32 = arith.constant 2 : i32
    %88 = vector.broadcast %c2_i32 : i32 to vector<8x32xi32>
    %89 = arith.cmpi eq, %17, %88 : vector<8x32xi32>
    %90 = vector.shape_cast %87 : vector<1x32xf32> to vector<1x32xf32>
    %91 = vector.broadcast %90 : vector<1x32xf32> to vector<8x32xf32>
    %92 = arith.select %89, %91, %68 : vector<8x32xi1>, vector<8x32xf32>
    %93 = vector.extract_strided_slice %16 {offsets = [3, 0], sizes = [1, 128], strides = [1, 1]} : vector<8x128xf32> to vector<1x128xf32>
    %cst_22 = arith.constant dense<0.000000e+00> : vector<1x128xf32>
    %94 = tpu.matmul %87, %7, %cst_22 {dimension_numbers = #tpu.dot_dimension_numbers<[1], [0], [0], [1], [0, 0, 1, 1], [], []>} : vector<1x32xf32>, vector<32x128xf32>, vector<1x128xf32> -> vector<1x128xf32>
    %95 = arith.addf %93, %94 : vector<1x128xf32>
    %96 = vector.extract_strided_slice %95 {offsets = [0, 0], sizes = [1, 96], strides = [1, 1]} : vector<1x128xf32> to vector<1x96xf32>
    %97 = arith.negf %96 : vector<1x96xf32>
    %98 = math.exp %97 : vector<1x96xf32>
    %cst_23 = arith.constant 1.000000e+00 : f32
    %99 = vector.broadcast %cst_23 : f32 to vector<1x96xf32>
    %100 = arith.addf %99, %98 : vector<1x96xf32>
    %101 = arith.divf %99, %100 : vector<1x96xf32>
    %102 = vector.extract_strided_slice %101 {offsets = [0, 0], sizes = [1, 32], strides = [1, 1]} : vector<1x96xf32> to vector<1x32xf32>
    %103 = vector.extract_strided_slice %101 {offsets = [0, 32], sizes = [1, 32], strides = [1, 1]} : vector<1x96xf32> to vector<1x32xf32>
    %104 = vector.extract_strided_slice %101 {offsets = [0, 64], sizes = [1, 32], strides = [1, 1]} : vector<1x96xf32> to vector<1x32xf32>
    %105 = vector.extract_strided_slice %95 {offsets = [0, 96], sizes = [1, 32], strides = [1, 1]} : vector<1x128xf32> to vector<1x32xf32>
    %106 = math.tanh %105 : vector<1x32xf32>
    %107 = arith.mulf %103, %85 : vector<1x32xf32>
    %108 = arith.mulf %102, %106 : vector<1x32xf32>
    %109 = arith.addf %107, %108 : vector<1x32xf32>
    %110 = math.tanh %109 : vector<1x32xf32>
    %111 = arith.mulf %104, %110 : vector<1x32xf32>
    %c3_i32 = arith.constant 3 : i32
    %112 = vector.broadcast %c3_i32 : i32 to vector<8x32xi32>
    %113 = arith.cmpi eq, %17, %112 : vector<8x32xi32>
    %114 = vector.shape_cast %111 : vector<1x32xf32> to vector<1x32xf32>
    %115 = vector.broadcast %114 : vector<1x32xf32> to vector<8x32xf32>
    %116 = arith.select %113, %115, %92 : vector<8x32xi1>, vector<8x32xf32>
    %117 = vector.extract_strided_slice %16 {offsets = [4, 0], sizes = [1, 128], strides = [1, 1]} : vector<8x128xf32> to vector<1x128xf32>
    %cst_24 = arith.constant dense<0.000000e+00> : vector<1x128xf32>
    %118 = tpu.matmul %111, %7, %cst_24 {dimension_numbers = #tpu.dot_dimension_numbers<[1], [0], [0], [1], [0, 0, 1, 1], [], []>} : vector<1x32xf32>, vector<32x128xf32>, vector<1x128xf32> -> vector<1x128xf32>
    %119 = arith.addf %117, %118 : vector<1x128xf32>
    %120 = vector.extract_strided_slice %119 {offsets = [0, 0], sizes = [1, 96], strides = [1, 1]} : vector<1x128xf32> to vector<1x96xf32>
    %121 = arith.negf %120 : vector<1x96xf32>
    %122 = math.exp %121 : vector<1x96xf32>
    %cst_25 = arith.constant 1.000000e+00 : f32
    %123 = vector.broadcast %cst_25 : f32 to vector<1x96xf32>
    %124 = arith.addf %123, %122 : vector<1x96xf32>
    %125 = arith.divf %123, %124 : vector<1x96xf32>
    %126 = vector.extract_strided_slice %125 {offsets = [0, 0], sizes = [1, 32], strides = [1, 1]} : vector<1x96xf32> to vector<1x32xf32>
    %127 = vector.extract_strided_slice %125 {offsets = [0, 32], sizes = [1, 32], strides = [1, 1]} : vector<1x96xf32> to vector<1x32xf32>
    %128 = vector.extract_strided_slice %125 {offsets = [0, 64], sizes = [1, 32], strides = [1, 1]} : vector<1x96xf32> to vector<1x32xf32>
    %129 = vector.extract_strided_slice %119 {offsets = [0, 96], sizes = [1, 32], strides = [1, 1]} : vector<1x128xf32> to vector<1x32xf32>
    %130 = math.tanh %129 : vector<1x32xf32>
    %131 = arith.mulf %127, %109 : vector<1x32xf32>
    %132 = arith.mulf %126, %130 : vector<1x32xf32>
    %133 = arith.addf %131, %132 : vector<1x32xf32>
    %134 = math.tanh %133 : vector<1x32xf32>
    %135 = arith.mulf %128, %134 : vector<1x32xf32>
    %c4_i32 = arith.constant 4 : i32
    %136 = vector.broadcast %c4_i32 : i32 to vector<8x32xi32>
    %137 = arith.cmpi eq, %17, %136 : vector<8x32xi32>
    %138 = vector.shape_cast %135 : vector<1x32xf32> to vector<1x32xf32>
    %139 = vector.broadcast %138 : vector<1x32xf32> to vector<8x32xf32>
    %140 = arith.select %137, %139, %116 : vector<8x32xi1>, vector<8x32xf32>
    %141 = vector.extract_strided_slice %16 {offsets = [5, 0], sizes = [1, 128], strides = [1, 1]} : vector<8x128xf32> to vector<1x128xf32>
    %cst_26 = arith.constant dense<0.000000e+00> : vector<1x128xf32>
    %142 = tpu.matmul %135, %7, %cst_26 {dimension_numbers = #tpu.dot_dimension_numbers<[1], [0], [0], [1], [0, 0, 1, 1], [], []>} : vector<1x32xf32>, vector<32x128xf32>, vector<1x128xf32> -> vector<1x128xf32>
    %143 = arith.addf %141, %142 : vector<1x128xf32>
    %144 = vector.extract_strided_slice %143 {offsets = [0, 0], sizes = [1, 96], strides = [1, 1]} : vector<1x128xf32> to vector<1x96xf32>
    %145 = arith.negf %144 : vector<1x96xf32>
    %146 = math.exp %145 : vector<1x96xf32>
    %cst_27 = arith.constant 1.000000e+00 : f32
    %147 = vector.broadcast %cst_27 : f32 to vector<1x96xf32>
    %148 = arith.addf %147, %146 : vector<1x96xf32>
    %149 = arith.divf %147, %148 : vector<1x96xf32>
    %150 = vector.extract_strided_slice %149 {offsets = [0, 0], sizes = [1, 32], strides = [1, 1]} : vector<1x96xf32> to vector<1x32xf32>
    %151 = vector.extract_strided_slice %149 {offsets = [0, 32], sizes = [1, 32], strides = [1, 1]} : vector<1x96xf32> to vector<1x32xf32>
    %152 = vector.extract_strided_slice %149 {offsets = [0, 64], sizes = [1, 32], strides = [1, 1]} : vector<1x96xf32> to vector<1x32xf32>
    %153 = vector.extract_strided_slice %143 {offsets = [0, 96], sizes = [1, 32], strides = [1, 1]} : vector<1x128xf32> to vector<1x32xf32>
    %154 = math.tanh %153 : vector<1x32xf32>
    %155 = arith.mulf %151, %133 : vector<1x32xf32>
    %156 = arith.mulf %150, %154 : vector<1x32xf32>
    %157 = arith.addf %155, %156 : vector<1x32xf32>
    %158 = math.tanh %157 : vector<1x32xf32>
    %159 = arith.mulf %152, %158 : vector<1x32xf32>
    %c5_i32 = arith.constant 5 : i32
    %160 = vector.broadcast %c5_i32 : i32 to vector<8x32xi32>
    %161 = arith.cmpi eq, %17, %160 : vector<8x32xi32>
    %162 = vector.shape_cast %159 : vector<1x32xf32> to vector<1x32xf32>
    %163 = vector.broadcast %162 : vector<1x32xf32> to vector<8x32xf32>
    %164 = arith.select %161, %163, %140 : vector<8x32xi1>, vector<8x32xf32>
    %165 = vector.extract_strided_slice %16 {offsets = [6, 0], sizes = [1, 128], strides = [1, 1]} : vector<8x128xf32> to vector<1x128xf32>
    %cst_28 = arith.constant dense<0.000000e+00> : vector<1x128xf32>
    %166 = tpu.matmul %159, %7, %cst_28 {dimension_numbers = #tpu.dot_dimension_numbers<[1], [0], [0], [1], [0, 0, 1, 1], [], []>} : vector<1x32xf32>, vector<32x128xf32>, vector<1x128xf32> -> vector<1x128xf32>
    %167 = arith.addf %165, %166 : vector<1x128xf32>
    %168 = vector.extract_strided_slice %167 {offsets = [0, 0], sizes = [1, 96], strides = [1, 1]} : vector<1x128xf32> to vector<1x96xf32>
    %169 = arith.negf %168 : vector<1x96xf32>
    %170 = math.exp %169 : vector<1x96xf32>
    %cst_29 = arith.constant 1.000000e+00 : f32
    %171 = vector.broadcast %cst_29 : f32 to vector<1x96xf32>
    %172 = arith.addf %171, %170 : vector<1x96xf32>
    %173 = arith.divf %171, %172 : vector<1x96xf32>
    %174 = vector.extract_strided_slice %173 {offsets = [0, 0], sizes = [1, 32], strides = [1, 1]} : vector<1x96xf32> to vector<1x32xf32>
    %175 = vector.extract_strided_slice %173 {offsets = [0, 32], sizes = [1, 32], strides = [1, 1]} : vector<1x96xf32> to vector<1x32xf32>
    %176 = vector.extract_strided_slice %173 {offsets = [0, 64], sizes = [1, 32], strides = [1, 1]} : vector<1x96xf32> to vector<1x32xf32>
    %177 = vector.extract_strided_slice %167 {offsets = [0, 96], sizes = [1, 32], strides = [1, 1]} : vector<1x128xf32> to vector<1x32xf32>
    %178 = math.tanh %177 : vector<1x32xf32>
    %179 = arith.mulf %175, %157 : vector<1x32xf32>
    %180 = arith.mulf %174, %178 : vector<1x32xf32>
    %181 = arith.addf %179, %180 : vector<1x32xf32>
    %182 = math.tanh %181 : vector<1x32xf32>
    %183 = arith.mulf %176, %182 : vector<1x32xf32>
    %c6_i32 = arith.constant 6 : i32
    %184 = vector.broadcast %c6_i32 : i32 to vector<8x32xi32>
    %185 = arith.cmpi eq, %17, %184 : vector<8x32xi32>
    %186 = vector.shape_cast %183 : vector<1x32xf32> to vector<1x32xf32>
    %187 = vector.broadcast %186 : vector<1x32xf32> to vector<8x32xf32>
    %188 = arith.select %185, %187, %164 : vector<8x32xi1>, vector<8x32xf32>
    %189 = vector.extract_strided_slice %16 {offsets = [7, 0], sizes = [1, 128], strides = [1, 1]} : vector<8x128xf32> to vector<1x128xf32>
    %cst_30 = arith.constant dense<0.000000e+00> : vector<1x128xf32>
    %190 = tpu.matmul %183, %7, %cst_30 {dimension_numbers = #tpu.dot_dimension_numbers<[1], [0], [0], [1], [0, 0, 1, 1], [], []>} : vector<1x32xf32>, vector<32x128xf32>, vector<1x128xf32> -> vector<1x128xf32>
    %191 = arith.addf %189, %190 : vector<1x128xf32>
    %192 = vector.extract_strided_slice %191 {offsets = [0, 0], sizes = [1, 96], strides = [1, 1]} : vector<1x128xf32> to vector<1x96xf32>
    %193 = arith.negf %192 : vector<1x96xf32>
    %194 = math.exp %193 : vector<1x96xf32>
    %cst_31 = arith.constant 1.000000e+00 : f32
    %195 = vector.broadcast %cst_31 : f32 to vector<1x96xf32>
    %196 = arith.addf %195, %194 : vector<1x96xf32>
    %197 = arith.divf %195, %196 : vector<1x96xf32>
    %198 = vector.extract_strided_slice %197 {offsets = [0, 0], sizes = [1, 32], strides = [1, 1]} : vector<1x96xf32> to vector<1x32xf32>
    %199 = vector.extract_strided_slice %197 {offsets = [0, 32], sizes = [1, 32], strides = [1, 1]} : vector<1x96xf32> to vector<1x32xf32>
    %200 = vector.extract_strided_slice %197 {offsets = [0, 64], sizes = [1, 32], strides = [1, 1]} : vector<1x96xf32> to vector<1x32xf32>
    %201 = vector.extract_strided_slice %191 {offsets = [0, 96], sizes = [1, 32], strides = [1, 1]} : vector<1x128xf32> to vector<1x32xf32>
    %202 = math.tanh %201 : vector<1x32xf32>
    %203 = arith.mulf %199, %181 : vector<1x32xf32>
    %204 = arith.mulf %198, %202 : vector<1x32xf32>
    %205 = arith.addf %203, %204 : vector<1x32xf32>
    %206 = math.tanh %205 : vector<1x32xf32>
    %207 = arith.mulf %200, %206 : vector<1x32xf32>
    %c7_i32 = arith.constant 7 : i32
    %208 = vector.broadcast %c7_i32 : i32 to vector<8x32xi32>
    %209 = arith.cmpi eq, %17, %208 : vector<8x32xi32>
    %210 = vector.shape_cast %207 : vector<1x32xf32> to vector<1x32xf32>
    %211 = vector.broadcast %210 : vector<1x32xf32> to vector<8x32xf32>
    %212 = arith.select %209, %211, %188 : vector<8x32xi1>, vector<8x32xf32>
    %c0_32 = arith.constant 0 : index
    %c0_33 = arith.constant 0 : index
    %213 = vector.load %arg2[%c0_32, %c0_33] : memref<72x1xf32, #tpu.memory_space<vmem>>, vector<32x1xf32>
    %c32 = arith.constant 32 : index
    %c0_34 = arith.constant 0 : index
    %214 = vector.load %arg2[%c32, %c0_34] : memref<72x1xf32, #tpu.memory_space<vmem>>, vector<32x1xf32>
    %c64 = arith.constant 64 : index
    %c0_35 = arith.constant 0 : index
    %215 = vector.load %arg2[%c64, %c0_35] : memref<72x1xf32, #tpu.memory_space<vmem>>, vector<7x1xf32>
    %c71 = arith.constant 71 : index
    %c0_36 = arith.constant 0 : index
    %216 = vector.load %arg2[%c71, %c0_36] : memref<72x1xf32, #tpu.memory_space<vmem>>, vector<1x1xf32>
    %cst_37 = arith.constant dense<0.000000e+00> : vector<8x1xf32>
    %217 = tpu.matmul %13, %213, %cst_37 {dimension_numbers = #tpu.dot_dimension_numbers<[1], [0], [0], [1], [0, 0, 1, 1], [], []>} : vector<8x32xf32>, vector<32x1xf32>, vector<8x1xf32> -> vector<8x1xf32>
    %cst_38 = arith.constant dense<0.000000e+00> : vector<8x1xf32>
    %218 = tpu.matmul %212, %214, %cst_38 {dimension_numbers = #tpu.dot_dimension_numbers<[1], [0], [0], [1], [0, 0, 1, 1], [], []>} : vector<8x32xf32>, vector<32x1xf32>, vector<8x1xf32> -> vector<8x1xf32>
    %219 = arith.addf %217, %218 : vector<8x1xf32>
    %cst_39 = arith.constant dense<0.000000e+00> : vector<8x1xf32>
    %220 = tpu.matmul %5, %215, %cst_39 {dimension_numbers = #tpu.dot_dimension_numbers<[1], [0], [0], [1], [0, 0, 1, 1], [], []>} : vector<8x7xf32>, vector<7x1xf32>, vector<8x1xf32> -> vector<8x1xf32>
    %221 = arith.addf %219, %220 : vector<8x1xf32>
    %222 = vector.broadcast %216 : vector<1x1xf32> to vector<8x1xf32>
    %223 = arith.addf %221, %222 : vector<8x1xf32>
    %c0_40 = arith.constant 0 : index
    %c0_41 = arith.constant 0 : index
    %224 = vector.load %arg3[%c0_40, %c0_41] : memref<8x1xf32, #tpu.memory_space<vmem>>, vector<8x1xf32>
    tpu.vector_store %arg3[%c0_40, %c0_41], %223 {strides = array<i32>} : memref<8x1xf32, #tpu.memory_space<vmem>>, vector<8x1xf32>,
    return
  }
}

</mosaic_0001>

<bundles_post_ra>
// kernel: model_forward.1
= control target key start
LH: loop header
LB: loop body
LE: loop exit
PB: predicated region body
PF: predicated region fallthrough
CT: control target
= control target key end

     0   :  { %vm82_vm0 = vcmask 1046528   ;;  %v1696_v0 = vmov 0.0   ;;  %vm1697_vm1 = vmmov 0   ;;  %vm59_vm2 = vcmask 1041409   ;;  %s1698_s4 = smov 32   ;;  %s1699_s5 = smov 64   ;;  %s2061_s1 = inlined_call_operand.vmem [shape: f32[48,128], index: 1, kind: input, shape index: {}]   ;;  %s2062_s0 = inlined_call_operand.vmem [shape: f32[8,3,7], index: 0, kind: input, shape index: {}]   ;;  %s2063_s2 = inlined_call_operand.vmem [shape: f32[72,1], index: 2, kind: input, shape index: {}]   ;;  %s2064_s3 = inlined_call_operand.vmem [shape: f32[8,1], index: 3, kind: output, shape index: {}]  }
   0x1   :  { %1503 = vmatprep.subr.mxu0 %v1696_v0  ;;  %v44_v1 = vld [vmem:[%s2061_s1 + $0x28] sm:$0x7f]  ;;  %1505 = vmatprep.mubr.msk.f32.mxu0 %vm1697_vm1, %v1696_v0  ;;  %v15_v2 = vld [vmem:[%s2062_s0 + $0x4] sm:$0x1]  ;;  %v18_v5 = vld [vmem:[%s2062_s0 + $0x10] sm:$0x1] }
   0x2   :  { %1504 = vmatpush3.msk.msra.mxu0 %vm82_vm0, %v44_v1  ;;  %v16_v3 = vld [vmem:[%s2062_s0 + $0x8] sm:$0x1]  ;;  %v17_v4 = vld [vmem:[%s2062_s0 + $0xc] sm:$0x1]  ;;  %1508 = vmatprep.subr.mxu1 %v1696_v0  ;;  %v14_v6 = vld [vmem:[%s2062_s0] sm:$0x1] }
   0x3   :  { %1513 = vmatprep.subr.mxu0 %v1696_v0  ;;  %v19_v7 = vld [vmem:[%s2062_s0 + $0x14] sm:$0x1]  ;;  %v20_v8 = vld [vmem:[%s2062_s0 + $0x18] sm:$0x1]  ;;  %1510 = vmatprep.mubr.msk.f32.mxu1 %vm1697_vm1, %v1696_v0  ;;  %v21_v9 = vld [vmem:[%s2062_s0 + $0x1c] sm:$0x1] }
   0x4   :  { %v58_v10 = vrot.slane %v15_v2, 7  ;;  %v61_v11 = vrot.slane %v16_v3, 6  ;;  %vm62_vm3 = vcmask 1042434   ;;  %v64_v12 = vrot.slane %v17_v4, 5  ;;  %v38_v14 = vld [vmem:[%s2061_s1] sm:$0x7f] }
   0x5   :  { %vm65_vm4 = vcmask 1043459   ;;  %v67_v13 = vrot.slane %v18_v5, 4  ;;  %vm68_vm5 = vcmask 1044484   ;;  %v70_v16 = vrot.slane %v19_v7, 3  ;;  %1509 = vmatpush3.msk.msra.mxu1 %vm82_vm0, %v38_v14  ;;  %v23_v20 = vld [vmem:[%s2062_s0 + $0x5] sm:$0x1] }
   0x6   :  { %v60_v15 = vsel %vm59_vm2, %v58_v10, %v14_v6  ;;  %vm71_vm6 = vcmask 1045509   ;;  %v73_v18 = vrot.slane %v20_v8, 2  ;;  %vm74_vm7 = vcmask 1046534   ;;  %1524 = vmatprep.subr.mxu1 %v1696_v0  ;;  %v24_v22 = vld [vmem:[%s2062_s0 + $0x9] sm:$0x1]  ;;  %v1790_v34 = vld [vmem:[%s2061_s1 + $0x1f] sm:$0xff] }
   0x7   :  { %v63_v17 = vsel %vm62_vm3, %v61_v11, %v60_v15  ;;  %v76_v19 = vrot.slane %v21_v9, 1  ;;  %v25_v23 = vld [vmem:[%s2062_s0 + $0xd] sm:$0x1]  ;;  %v26_v24 = vld [vmem:[%s2062_s0 + $0x11] sm:$0x1]  ;;  %vm77_vm8 = vcmask 1047559  }
   0x8   :  { %v66_v21 = vsel %vm65_vm4, %v64_v12, %v63_v17  ;;  %vm79_vm9 = vcmask 56320   ;;  %v22_v26 = vld [vmem:[%s2062_s0 + $0x1] sm:$0x1]  ;;  %v27_v27 = vld [vmem:[%s2062_s0 + $0x15] sm:$0x1]  ;;  %v168_v30 = vrot.slane %v23_v20, 7 }
   0x9   :  { %v69_v25 = vsel %vm68_vm5, %v67_v13, %v66_v21  ;;  %v28_v29 = vld [vmem:[%s2062_s0 + $0x19] sm:$0x1]  ;;  %v170_v31 = vrot.slane %v24_v22, 6  ;;  %v172_v32 = vrot.slane %v25_v23, 5  ;;  %v29_v35 = vld [vmem:[%s2062_s0 + $0x1d] sm:$0x1] }
   0xa   :  { %v72_v28 = vsel %vm71_vm6, %v70_v16, %v69_v25  ;;  %v174_v36 = vrot.slane %v26_v24, 4  ;;  %v169_v38 = vsel %vm59_vm2, %v168_v30, %v22_v26  ;;  %v176_v39 = vrot.slane %v27_v27, 3  ;;  %v1801_v40 = vld [vmem:[%s2061_s1 + $0x17] sm:$0xff]  ;;  %v1813_v46 = vld [vmem:[%s2061_s1 + $0xf] sm:$0xff]  ;;  %v1822_v49 = vld [vmem:[%s2061_s1 + $0x7] sm:$0xff] }
   0xb   :  { %v75_v33 = vsel %vm74_vm7, %v73_v18, %v72_v28  ;;  %v171_v41 = vsel %vm62_vm3, %v170_v31, %v169_v38  ;;  %v178_v42 = vrot.slane %v28_v29, 2  ;;  %v180_v44 = vrot.slane %v29_v35, 1  ;;  %v1424_v53 = vld [vmem:[%s2061_s1 + $0x27] ss:$0 sm:$0xff] }
   0xc   :  { %v78_v37 = vsel %vm77_vm8, %v76_v19, %v75_v33  ;;  %v173_v43 = vsel %vm65_vm4, %v172_v32, %v171_v41  ;;  %vm259_vm10 = vcmask 261120   ;;  %v257_v27 = vlaneseq }
   0xd   :  { %1506 = vmatmul.mubr.msk.f32.vlgmr.msra.gmra.mxu0 %vm79_vm9, %v78_v37  ;;  %v175_v45 = vsel %vm68_vm5, %v174_v36, %v173_v43 }
   0xe   :  { %1514 = vmatpush3.msra.mxu0 %v1790_v34  ;;  %1521 = vmatprep.mubr.msk.f32.mxu0 %vm1697_vm1, %v1696_v0  ;;  %v177_v47 = vsel %vm71_vm6, %v176_v39, %v175_v45  ;;  %v1878_v28 = vshrl.u32 %v257_v27, 7 }
   0xf   :  { %1515 = vmatprep.subr.mxu0 %v1696_v0  ;;  %v179_v48 = vsel %vm74_vm7, %v178_v42, %v177_v47 }
  0x10   :  { %1516 = vmatpush3.msra.mxu0 %v1801_v40  ;;  %v181_v50 = vsel %vm77_vm8, %v180_v44, %v179_v48  ;;  %v361_v29 = vsub.s32 0, %v1878_v28  ;;  %v473_v30 = vsub.s32 1, %v1878_v28  ;;  %vm358_vm11 = vcmp.eq.s32.totalorder %v1878_v28, 0 }
  0x11   :  { %1517 = vmatprep.subr.mxu0 %v1696_v0  ;;  %1511 = vmatmul.mubr.msk.f32.vlgmr.msra.gmra.mxu1 %vm79_vm9, %v181_v50  ;;  %vm470_vm12 = vcmp.eq.s32.totalorder %v1878_v28, 1  ;;  %vm583_vm13 = vcmp.eq.s32.totalorder %v1878_v28, 2  ;;  %vm696_vm14 = vcmp.eq.s32.totalorder %v1878_v28, 3  ;;  %vm809_vm15 = vcmp.eq.s32.totalorder %v1878_v28, 4 }
  0x12   :  { %1518 = vmatpush3.msra.mxu0 %v1813_v46  ;;  %1525 = vmatpush3.msra.mxu1 %v1790_v34 }
  0x13   :  { %1519 = vmatprep.subr.mxu0 %v1696_v0  ;;  %1526 = vmatprep.subr.mxu1 %v1696_v0 }
  0x14   :  { %1520 = vmatpush3.msra.mxu0 %v1822_v49  ;;  %1527 = vmatpush3.msra.mxu1 %v1801_v40 }
  0x15   :  { %1522 = vmatmul.mubr.f32.vlgmr.msra.gmra.mxu0 %v1696_v0  ;;  %1532 = vmatprep.mubr.msk.f32.mxu1 %vm1697_vm1, %v1696_v0 }
  0x16   :  { %1528 = vmatprep.subr.mxu1 %v1696_v0  ;;  %1535 = vmatprep.subr.mxu0 %v1696_v0 }
  0x17   :  { %1529 = vmatpush3.msra.mxu1 %v1813_v46  ;;  %1536 = vmatpush3.msra.mxu0 %v1790_v34 }
  0x18   :  { %1530 = vmatprep.subr.mxu1 %v1696_v0  ;;  %1537 = vmatprep.subr.mxu0 %v1696_v0 }
  0x19   :  { %1531 = vmatpush3.msra.mxu1 %v1822_v49  ;;  %1538 = vmatpush3.msra.mxu0 %v1801_v40 }
  0x1a   :  { %1539 = vmatprep.subr.mxu0 %v1696_v0  ;;  %1543 = vmatprep.mubr.msk.f32.mxu0 %vm1697_vm1, %v1696_v0 }
  0x1b   :  { %1540 = vmatpush3.msra.mxu0 %v1813_v46  ;;  %1546 = vmatprep.subr.mxu1 %v1696_v0 }
  0x1c   :  { %1541 = vmatprep.subr.mxu0 %v1696_v0 }
  0x1d   :  { %1542 = vmatpush3.msra.mxu0 %v1822_v49 }
  0x1e   :  { %1557 = vmatprep.subr.mxu0 %v1696_v0 }
  0xcd   :  { %v1851_v51 = vpop.f32.mrf.mxu0 }
  0xcf   :  { %v1507_v52 = vpop.f32.mrf.mxu0 }
  0xd1   :  { %v253_v54 = vpop.f32.mrf.mxu1 }
  0xd2   :  { %v1856_v55 = vadd.f32 %v1424_v53, %v253_v54 }
  0xd3   :  { %v1512_v56 = vpop.f32.mrf.mxu1 }
  0xd5   :  { %v329_v57 = vpop.f32.mrf.mxu0 }
  0xd6   :  { %v333_v58 = vadd.f32 %v329_v57, %v1856_v55 }
  0xd7   :  { %v1523_v59 = vpop.f32.mrf.mxu0 }
  0xd8   :  { %1632 = vtanh.f32 %v333_v58  ;;  %v1427_v61 = vmul.f32 -1.442695, %v333_v58 }
  0xda   :  { %1634 = vpow2.f32 %v1427_v61  ;;  %v586_v61 = vsub.s32 2, %v1878_v28 }
  0xe5   :  { %v1633_v60 = vpop.eup %1632 }
  0xe6   :  { %343 = vrot.lane.b32.xlu0 %v1633_v60, %s1698_s4 }
  0xe7   :  { %v1635_v62 = vpop.eup %1634 }
  0xe8   :  { %v337_v63 = vadd.f32 1.0, %v1635_v62 }
  0xea   :  { %1636 = vrcp.f32 %v337_v63 }
  0xf7   :  { %v1637_v1 = vpop.eup %1636 }
  0xf8   :  { %v341_v4 = vmul.f32 0.0, %v1637_v1 }
 0x158   :  { %v344_v2 = vpop.permute.xlu0 %343 }
 0x159   :  { %v346_v3 = vmul.f32 %v1637_v1, %v344_v2 }
 0x15b   :  { %348 = vrot.lane.b32.xlu0 %v346_v3, %s1698_s4 }
 0x1cd   :  { %v349_v5 = vpop.permute.xlu0 %348 }
 0x1ce   :  { %v351_v6 = vadd.f32 %v349_v5, %v341_v4 }
 0x1d0   :  { %1638 = vtanh.f32 %v351_v6  ;;  %v451_v22 = vrot.slane %v351_v6, 7 }
 0x1dd   :  { %v1639_v7 = vpop.eup %1638 }
 0x1de   :  { %354 = vrot.lane.b32.xlu1 %v1639_v7, %s1698_s4 }
 0x250   :  { %v355_v8 = vpop.permute.xlu1 %354 }
 0x251   :  { %v357_v9 = vmul.f32 %v1637_v1, %v355_v8 }
 0x253   :  { %365 = vrot.lane.b32.xlu1 %v357_v9, %s1699_s5  ;;  %v362_v31 = vrot.slane %v357_v9, %v361_v29 }
 0x255   :  { %v363_v37 = vsel %vm358_vm11, %v362_v31, 0.0  ;;  %vm922_vm11 = vcmp.eq.s32.totalorder %v1878_v28, 5 }
 0x2c5   :  { %v366_v10 = vpop.permute.xlu1 %365 }
 0x2c6   :  { %1533 = vmatmul.mubr.msk.f32.vlgmr.msra.gmra.mxu1 %vm259_vm10, %v366_v10 }
 0x2c7   :  { %1547 = vmatpush3.msra.mxu1 %v1790_v34  ;;  %1554 = vmatprep.mubr.msk.f32.mxu1 %vm1697_vm1, %v1696_v0 }
 0x2c8   :  { %1548 = vmatprep.subr.mxu1 %v1696_v0 }
 0x2c9   :  { %1549 = vmatpush3.msra.mxu1 %v1801_v40 }
 0x2ca   :  { %1550 = vmatprep.subr.mxu1 %v1696_v0 }
 0x2cb   :  { %1551 = vmatpush3.msra.mxu1 %v1813_v46 }
 0x2cc   :  { %1552 = vmatprep.subr.mxu1 %v1696_v0 }
 0x2cd   :  { %1553 = vmatpush3.msra.mxu1 %v1822_v49 }
 0x2ce   :  { %1568 = vmatprep.subr.mxu1 %v1696_v0 }
 0x386   :  { %v435_v11 = vpop.f32.mrf.mxu1 }
 0x387   :  { %v440_v12 = vrot.slane %v435_v11, 7 }
 0x388   :  { %v1534_v13 = vpop.f32.mrf.mxu1 }
 0x389   :  { %v442_v14 = vadd.f32 %v440_v12, %v1856_v55 }
 0x38b   :  { %1640 = vtanh.f32 %v442_v14  ;;  %v1429_v16 = vmul.f32 -1.442695, %v442_v14 }
 0x38d   :  { %1642 = vpow2.f32 %v1429_v16 }
 0x398   :  { %v1641_v15 = vpop.eup %1640 }
 0x399   :  { %455 = vrot.lane.b32.xlu0 %v1641_v15, %s1698_s4 }
 0x39a   :  { %v1643_v17 = vpop.eup %1642 }
 0x39b   :  { %v446_v18 = vadd.f32 1.0, %v1643_v17 }
 0x39d   :  { %1644 = vrcp.f32 %v446_v18 }
 0x3aa   :  { %v1645_v19 = vpop.eup %1644 }
 0x3ab   :  { %v453_v23 = vmul.f32 %v1645_v19, %v451_v22 }
 0x40b   :  { %v456_v20 = vpop.permute.xlu0 %455 }
 0x40c   :  { %v458_v21 = vmul.f32 %v1645_v19, %v456_v20 }
 0x40e   :  { %460 = vrot.lane.b32.xlu1 %v458_v21, %s1698_s4  ;;  %v699_v21 = vsub.s32 3, %v1878_v28 }
 0x480   :  { %v461_v24 = vpop.permute.xlu1 %460 }
 0x481   :  { %v463_v25 = vadd.f32 %v461_v24, %v453_v23 }
 0x483   :  { %1646 = vtanh.f32 %v463_v25  ;;  %v564_v56 = vrot.slane %v463_v25, 7 }
 0x490   :  { %v1647_v26 = vpop.eup %1646 }
 0x491   :  { %466 = vrot.lane.b32.xlu0 %v1647_v26, %s1698_s4 }
 0x503   :  { %v467_v32 = vpop.permute.xlu0 %466 }
 0x504   :  { %v469_v33 = vmul.f32 %v1645_v19, %v467_v32 }
 0x506   :  { %v474_v35 = vrot.slane %v469_v33, %v473_v30  ;;  %v477_v36 = vrot.slane %v469_v33, 1 }
 0x508   :  { %v475_v38 = vsel %vm470_vm12, %v474_v35, %v363_v37  ;;  %478 = vrot.lane.b32.xlu1 %v477_v36, %s1699_s5  ;;  %vm1035_vm12 = vcmp.eq.s32.totalorder %v1878_v28, 6 }
 0x57a   :  { %v479_v39 = vpop.permute.xlu1 %478 }
 0x57b   :  { %1544 = vmatmul.mubr.msk.f32.vlgmr.msra.gmra.mxu0 %vm259_vm10, %v479_v39 }
 0x57c   :  { %1558 = vmatpush3.msra.mxu0 %v1790_v34  ;;  %1565 = vmatprep.mubr.msk.f32.mxu0 %vm1697_vm1, %v1696_v0 }
 0x57d   :  { %1559 = vmatprep.subr.mxu0 %v1696_v0 }
 0x57e   :  { %1560 = vmatpush3.msra.mxu0 %v1801_v40 }
 0x57f   :  { %1561 = vmatprep.subr.mxu0 %v1696_v0 }
 0x580   :  { %1562 = vmatpush3.msra.mxu0 %v1813_v46 }
 0x581   :  { %1563 = vmatprep.subr.mxu0 %v1696_v0 }
 0x582   :  { %1564 = vmatpush3.msra.mxu0 %v1822_v49 }
 0x583   :  { %1579 = vmatprep.subr.mxu0 %v1696_v0 }
 0x63b   :  { %v548_v41 = vpop.f32.mrf.mxu0 }
 0x63c   :  { %v553_v42 = vrot.slane %v548_v41, 6 }
 0x63d   :  { %v1545_v43 = vpop.f32.mrf.mxu0 }
 0x63e   :  { %v555_v44 = vadd.f32 %v553_v42, %v1856_v55 }
 0x640   :  { %1648 = vtanh.f32 %v555_v44  ;;  %v1431_v47 = vmul.f32 -1.442695, %v555_v44 }
 0x642   :  { %1650 = vpow2.f32 %v1431_v47 }
 0x64d   :  { %v1649_v45 = vpop.eup %1648 }
 0x64e   :  { %568 = vrot.lane.b32.xlu0 %v1649_v45, %s1698_s4 }
 0x64f   :  { %v1651_v48 = vpop.eup %1650 }
 0x650   :  { %v559_v50 = vadd.f32 1.0, %v1651_v48  ;;  %v812_v48 = vsub.s32 4, %v1878_v28 }
 0x652   :  { %1652 = vrcp.f32 %v559_v50 }
 0x65f   :  { %v1653_v52 = vpop.eup %1652 }
 0x660   :  { %v566_v57 = vmul.f32 %v1653_v52, %v564_v56 }
 0x6c0   :  { %v569_v53 = vpop.permute.xlu0 %568 }
 0x6c1   :  { %v571_v54 = vmul.f32 %v1653_v52, %v569_v53 }
 0x6c3   :  { %573 = vrot.lane.b32.xlu1 %v571_v54, %s1698_s4 }
 0x735   :  { %v574_v58 = vpop.permute.xlu1 %573 }
 0x736   :  { %v576_v59 = vadd.f32 %v574_v58, %v566_v57 }
 0x738   :  { %1654 = vtanh.f32 %v576_v59  ;;  %v677_v16 = vrot.slane %v576_v59, 7 }
 0x745   :  { %v1655_v60 = vpop.eup %1654 }
 0x746   :  { %579 = vrot.lane.b32.xlu0 %v1655_v60, %s1698_s4 }
 0x7b8   :  { %v580_v62 = vpop.permute.xlu0 %579 }
 0x7b9   :  { %v582_v63 = vmul.f32 %v1653_v52, %v580_v62 }
 0x7bb   :  { %v587_v1 = vrot.slane %v582_v63, %v586_v61  ;;  %v590_v2 = vrot.slane %v582_v63, 2 }
 0x7bd   :  { %v588_v3 = vsel %vm583_vm13, %v587_v1, %v475_v38  ;;  %591 = vrot.lane.b32.xlu1 %v590_v2, %s1699_s5  ;;  %vm1148_vm13 = vcmp.eq.s32.totalorder %v1878_v28, 7 }
 0x82f   :  { %v592_v4 = vpop.permute.xlu1 %591 }
 0x830   :  { %1555 = vmatmul.mubr.msk.f32.vlgmr.msra.gmra.mxu1 %vm259_vm10, %v592_v4 }
 0x831   :  { %1569 = vmatpush3.msra.mxu1 %v1790_v34  ;;  %1576 = vmatprep.mubr.msk.f32.mxu1 %vm1697_vm1, %v1696_v0 }
 0x832   :  { %1570 = vmatprep.subr.mxu1 %v1696_v0 }
 0x833   :  { %1571 = vmatpush3.msra.mxu1 %v1801_v40 }
 0x834   :  { %1572 = vmatprep.subr.mxu1 %v1696_v0 }
 0x835   :  { %1573 = vmatpush3.msra.mxu1 %v1813_v46 }
 0x836   :  { %1574 = vmatprep.subr.mxu1 %v1696_v0 }
 0x837   :  { %1575 = vmatpush3.msra.mxu1 %v1822_v49 }
 0x838   :  { %1590 = vmatprep.subr.mxu1 %v1696_v0 }
 0x8f0   :  { %v661_v5 = vpop.f32.mrf.mxu1 }
 0x8f1   :  { %v666_v6 = vrot.slane %v661_v5, 5 }
 0x8f2   :  { %v1556_v7 = vpop.f32.mrf.mxu1 }
 0x8f3   :  { %v668_v8 = vadd.f32 %v666_v6, %v1856_v55  ;;  %v925_v7 = vsub.s32 5, %v1878_v28 }
 0x8f5   :  { %1656 = vtanh.f32 %v668_v8  ;;  %v1433_v10 = vmul.f32 -1.442695, %v668_v8 }
 0x8f7   :  { %1658 = vpow2.f32 %v1433_v10 }
 0x902   :  { %v1657_v9 = vpop.eup %1656 }
 0x903   :  { %681 = vrot.lane.b32.xlu0 %v1657_v9, %s1698_s4 }
 0x904   :  { %v1659_v11 = vpop.eup %1658 }
 0x905   :  { %v672_v12 = vadd.f32 1.0, %v1659_v11 }
 0x907   :  { %1660 = vrcp.f32 %v672_v12 }
 0x914   :  { %v1661_v13 = vpop.eup %1660 }
 0x915   :  { %v679_v17 = vmul.f32 %v1661_v13, %v677_v16 }
 0x975   :  { %v682_v14 = vpop.permute.xlu0 %681 }
 0x976   :  { %v684_v15 = vmul.f32 %v1661_v13, %v682_v14 }
 0x978   :  { %686 = vrot.lane.b32.xlu1 %v684_v15, %s1698_s4 }
 0x9ea   :  { %v687_v18 = vpop.permute.xlu1 %686 }
 0x9eb   :  { %v689_v19 = vadd.f32 %v687_v18, %v679_v17 }
 0x9ed   :  { %1662 = vtanh.f32 %v689_v19  ;;  %v790_v42 = vrot.slane %v689_v19, 7 }
 0x9fa   :  { %v1663_v20 = vpop.eup %1662 }
 0x9fb   :  { %692 = vrot.lane.b32.xlu0 %v1663_v20, %s1698_s4 }
 0xa6d   :  { %v693_v22 = vpop.permute.xlu0 %692 }
 0xa6e   :  { %v695_v23 = vmul.f32 %v1661_v13, %v693_v22 }
 0xa70   :  { %v700_v24 = vrot.slane %v695_v23, %v699_v21  ;;  %v703_v25 = vrot.slane %v695_v23, 3 }
 0xa72   :  { %v701_v26 = vsel %vm696_vm14, %v700_v24, %v588_v3  ;;  %704 = vrot.lane.b32.xlu1 %v703_v25, %s1699_s5 }
 0xae4   :  { %v705_v27 = vpop.permute.xlu1 %704 }
 0xae5   :  { %1566 = vmatmul.mubr.msk.f32.vlgmr.msra.gmra.mxu0 %vm259_vm10, %v705_v27 }
 0xae6   :  { %1580 = vmatpush3.msra.mxu0 %v1790_v34  ;;  %1587 = vmatprep.mubr.msk.f32.mxu0 %vm1697_vm1, %v1696_v0 }
 0xae7   :  { %1581 = vmatprep.subr.mxu0 %v1696_v0 }
 0xae8   :  { %1582 = vmatpush3.msra.mxu0 %v1801_v40 }
 0xae9   :  { %1583 = vmatprep.subr.mxu0 %v1696_v0 }
 0xaea   :  { %1584 = vmatpush3.msra.mxu0 %v1813_v46 }
 0xaeb   :  { %1585 = vmatprep.subr.mxu0 %v1696_v0 }
 0xaec   :  { %1586 = vmatpush3.msra.mxu0 %v1822_v49 }
 0xaed   :  { %1601 = vmatprep.subr.mxu0 %v1696_v0 }
 0xba5   :  { %v774_v29 = vpop.f32.mrf.mxu0 }
 0xba6   :  { %v779_v30 = vrot.slane %v774_v29, 4 }
 0xba7   :  { %v1567_v31 = vpop.f32.mrf.mxu0 }
 0xba8   :  { %v781_v32 = vadd.f32 %v779_v30, %v1856_v55  ;;  %v1038_v31 = vsub.s32 6, %v1878_v28 }
 0xbaa   :  { %1664 = vtanh.f32 %v781_v32  ;;  %v1435_v35 = vmul.f32 -1.442695, %v781_v32 }
 0xbac   :  { %1666 = vpow2.f32 %v1435_v35 }
 0xbb7   :  { %v1665_v33 = vpop.eup %1664 }
 0xbb8   :  { %794 = vrot.lane.b32.xlu0 %v1665_v33, %s1698_s4 }
 0xbb9   :  { %v1667_v36 = vpop.eup %1666 }
 0xbba   :  { %v785_v37 = vadd.f32 1.0, %v1667_v36 }
 0xbbc   :  { %1668 = vrcp.f32 %v785_v37 }
 0xbc9   :  { %v1669_v38 = vpop.eup %1668 }
 0xbca   :  { %v792_v43 = vmul.f32 %v1669_v38, %v790_v42  ;;  %v1155_v42 = vld [vmem:[%s2063_s2 + $0x8] sm:$0xff] }
 0xc2a   :  { %v795_v39 = vpop.permute.xlu0 %794 }
 0xc2b   :  { %v797_v41 = vmul.f32 %v1669_v38, %v795_v39 }
 0xc2d   :  { %799 = vrot.lane.b32.xlu1 %v797_v41, %s1698_s4  ;;  %v1156_v41 = vld [vmem:[%s2063_s2 + $0x10] sm:$0xff] }
 0xc9f   :  { %v800_v44 = vpop.permute.xlu1 %799 }
 0xca0   :  { %v802_v45 = vadd.f32 %v800_v44, %v792_v43  ;;  %v1421_v43 = vld [vmem:[%s2061_s1 + $0x2f] ss:$0 sm:$0xff]  ;;  %v1154_v44 = vld [vmem:[%s2063_s2] sm:$0xff] }
 0xca2   :  { %1670 = vtanh.f32 %v802_v45 }
 0xcaf   :  { %v1671_v47 = vpop.eup %1670 }
 0xcb0   :  { %805 = vrot.lane.b32.xlu0 %v1671_v47, %s1698_s4 }
 0xd22   :  { %v806_v50 = vpop.permute.xlu0 %805 }
 0xd23   :  { %v808_v52 = vmul.f32 %v1669_v38, %v806_v50  ;;  %v1157_v38 = vld [vmem:[%s2063_s2 + $0x18] sm:$0xff] }
 0xd25   :  { %v813_v53 = vrot.slane %v808_v52, %v812_v48  ;;  %v816_v54 = vrot.slane %v808_v52, 4 }
 0xd27   :  { %v814_v56 = vsel %vm809_vm15, %v813_v53, %v701_v26  ;;  %817 = vrot.lane.b32.xlu1 %v816_v54, %s1699_s5 }
 0xd99   :  { %v818_v57 = vpop.permute.xlu1 %817 }
 0xd9a   :  { %1577 = vmatmul.mubr.msk.f32.vlgmr.msra.gmra.mxu1 %vm259_vm10, %v818_v57 }
 0xd9b   :  { %1591 = vmatpush3.msra.mxu1 %v1790_v34  ;;  %1598 = vmatprep.mubr.msk.f32.mxu1 %vm1697_vm1, %v1696_v0 }
 0xd9c   :  { %1592 = vmatprep.subr.mxu1 %v1696_v0 }
 0xd9d   :  { %1593 = vmatpush3.msra.mxu1 %v1801_v40 }
 0xd9e   :  { %1594 = vmatprep.subr.mxu1 %v1696_v0 }
 0xd9f   :  { %1595 = vmatpush3.msra.mxu1 %v1813_v46 }
 0xda0   :  { %1596 = vmatprep.subr.mxu1 %v1696_v0 }
 0xda1   :  { %1597 = vmatpush3.msra.mxu1 %v1822_v49  ;;  %v903_v49 = vrot.slane %v802_v45, 7  ;;  %v153_v45 = vadd.f32 %v1421_v43, %v1851_v51 }
 0xda2   :  { %1612 = vmatprep.subr.mxu1 %v1696_v0 }
 0xe5a   :  { %v887_v58 = vpop.f32.mrf.mxu1 }
 0xe5b   :  { %v892_v59 = vrot.slane %v887_v58, 3 }
 0xe5c   :  { %v1578_v34 = vpop.f32.mrf.mxu1 }
 0xe5d   :  { %v894_v60 = vadd.f32 %v892_v59, %v1856_v55 }
 0xe5f   :  { %1672 = vtanh.f32 %v894_v60  ;;  %v1437_v40 = vmul.f32 -1.442695, %v894_v60 }
 0xe61   :  { %1674 = vpow2.f32 %v1437_v40 }
 0xe6c   :  { %v1673_v61 = vpop.eup %1672 }
 0xe6d   :  { %907 = vrot.lane.b32.xlu0 %v1673_v61, %s1698_s4 }
 0xe6e   :  { %v1675_v62 = vpop.eup %1674 }
 0xe6f   :  { %v898_v63 = vadd.f32 1.0, %v1675_v62 }
 0xe71   :  { %1676 = vrcp.f32 %v898_v63  ;;  %v1161_v63 = vld [vmem:[%s2063_s2 + $0x38] sm:$0xff] }
 0xe7e   :  { %v1677_v46 = vpop.eup %1676 }
 0xe7f   :  { %v905_v3 = vmul.f32 %v1677_v46, %v903_v49 }
 0xedf   :  { %v908_v1 = vpop.permute.xlu0 %907 }
 0xee0   :  { %v910_v2 = vmul.f32 %v1677_v46, %v908_v1  ;;  %v1159_v1 = vld [vmem:[%s2063_s2 + $0x28] sm:$0xff] }
 0xee2   :  { %912 = vrot.lane.b32.xlu1 %v910_v2, %s1698_s4  ;;  %v1158_v2 = vld [vmem:[%s2063_s2 + $0x20] sm:$0xff] }
 0xf54   :  { %v913_v4 = vpop.permute.xlu1 %912 }
 0xf55   :  { %v915_v5 = vadd.f32 %v913_v4, %v905_v3  ;;  %v1151_v3 = vsub.s32 7, %v1878_v28  ;;  %v33_v28 = vld [vmem:[%s2062_s0 + $0xe] sm:$0x1] }
 0xf57   :  { %1678 = vtanh.f32 %v915_v5  ;;  %v1016_v25 = vrot.slane %v915_v5, 7 }
 0xf64   :  { %v1679_v6 = vpop.eup %1678 }
 0xf65   :  { %918 = vrot.lane.b32.xlu0 %v1679_v6, %s1698_s4 }
 0xfd7   :  { %v919_v8 = vpop.permute.xlu0 %918 }
 0xfd8   :  { %v921_v9 = vmul.f32 %v1677_v46, %v919_v8  ;;  %v1160_v46 = vld [vmem:[%s2063_s2 + $0x30] sm:$0xff]  ;;  %v31_v8 = vld [vmem:[%s2062_s0 + $0x6] sm:$0x1] }
 0xfda   :  { %v926_v10 = vrot.slane %v921_v9, %v925_v7  ;;  %v929_v11 = vrot.slane %v921_v9, 5  ;;  %v32_v9 = vld [vmem:[%s2062_s0 + $0xa] sm:$0x1] }
 0xfdc   :  { %930 = vrot.lane.b32.xlu1 %v929_v11, %s1699_s5  ;;  %v927_v12 = vsel %vm922_vm11, %v926_v10, %v814_v56  ;;  %v1320_v10 = vrot.slane %v31_v8, 7  ;;  %v30_v11 = vld [vmem:[%s2062_s0 + $0x2] sm:$0x1] }
0x104e   :  { %v931_v13 = vpop.permute.xlu1 %930 }
0x104f   :  { %1588 = vmatmul.mubr.msk.f32.vlgmr.msra.gmra.mxu0 %vm259_vm10, %v931_v13  ;;  %v1321_v13 = vsel %vm59_vm2, %v1320_v10, %v30_v11  ;;  %vm1415_vm2 = vcmask 7168  }
0x1050   :  { %1609 = vmatprep.mubr.msk.f32.mxu0 %vm1697_vm1, %v1696_v0  ;;  %1602 = vmatpush3.msra.mxu0 %v1161_v63 }
0x1051   :  { %1603 = vmatprep.subr.mxu0 %v1696_v0 }
0x1052   :  { %1604 = vmatpush3.msra.mxu0 %v1160_v46 }
0x1053   :  { %1605 = vmatprep.subr.mxu0 %v1696_v0 }
0x1054   :  { %1606 = vmatpush3.msra.mxu0 %v1159_v1 }
0x1055   :  { %1607 = vmatprep.subr.mxu0 %v1696_v0 }
0x1056   :  { %1608 = vmatpush3.msra.mxu0 %v1158_v2 }
0x1057   :  { %1623 = vmatprep.subr.mxu0 %v1696_v0 }
0x110f   :  { %v1000_v14 = vpop.f32.mrf.mxu0 }
0x1110   :  { %v1005_v15 = vrot.slane %v1000_v14, 2  ;;  %v34_v14 = vld [vmem:[%s2062_s0 + $0x12] sm:$0x1] }
0x1111   :  { %v1589_v16 = vpop.f32.mrf.mxu0 }
0x1112   :  { %v1007_v17 = vadd.f32 %v1005_v15, %v1856_v55  ;;  %v1324_v15 = vrot.slane %v33_v28, 5 }
0x1114   :  { %1680 = vtanh.f32 %v1007_v17  ;;  %v1439_v19 = vmul.f32 -1.442695, %v1007_v17  ;;  %v35_v17 = vld [vmem:[%s2062_s0 + $0x16] sm:$0x1] }
0x1116   :  { %1682 = vpow2.f32 %v1439_v19 }
0x1121   :  { %v1681_v18 = vpop.eup %1680 }
0x1122   :  { %1020 = vrot.lane.b32.xlu0 %v1681_v18, %s1698_s4  ;;  %v1326_v18 = vrot.slane %v34_v14, 4 }
0x1123   :  { %v1683_v20 = vpop.eup %1682 }
0x1124   :  { %v1011_v21 = vadd.f32 1.0, %v1683_v20  ;;  %v36_v20 = vld [vmem:[%s2062_s0 + $0x1a] sm:$0x1] }
0x1126   :  { %1684 = vrcp.f32 %v1011_v21  ;;  %v1328_v21 = vrot.slane %v35_v17, 3 }
0x1133   :  { %v1685_v22 = vpop.eup %1684 }
0x1134   :  { %v1018_v26 = vmul.f32 %v1685_v22, %v1016_v25 }
0x1194   :  { %v1021_v23 = vpop.permute.xlu0 %1020 }
0x1195   :  { %v1023_v24 = vmul.f32 %v1685_v22, %v1021_v23  ;;  %v37_v23 = vld [vmem:[%s2062_s0 + $0x1e] sm:$0x1] }
0x1197   :  { %1025 = vrot.lane.b32.xlu1 %v1023_v24, %s1698_s4  ;;  %v1330_v24 = vrot.slane %v36_v20, 2 }
0x1209   :  { %v1026_v27 = vpop.permute.xlu1 %1025 }
0x120a   :  { %v1028_v29 = vadd.f32 %v1026_v27, %v1018_v26  ;;  %v1332_v26 = vrot.slane %v37_v23, 1  ;;  %v1162_v27 = vld [vmem:[%s2063_s2 + $0x40] sm:$0x7f] }
0x120c   :  { %1686 = vtanh.f32 %v1028_v29  ;;  %v1129_v61 = vrot.slane %v1028_v29, 7 }
0x1219   :  { %v1687_v30 = vpop.eup %1686 }
0x121a   :  { %1031 = vrot.lane.b32.xlu0 %v1687_v30, %s1698_s4 }
0x128c   :  { %v1032_v32 = vpop.permute.xlu0 %1031 }
0x128d   :  { %v1034_v33 = vmul.f32 %v1685_v22, %v1032_v32 }
0x128f   :  { %v1039_v35 = vrot.slane %v1034_v33, %v1038_v31  ;;  %v1042_v36 = vrot.slane %v1034_v33, 6 }
0x1291   :  { %1043 = vrot.lane.b32.xlu1 %v1042_v36, %s1699_s5  ;;  %v1040_v37 = vsel %vm1035_vm12, %v1039_v35, %v927_v12  ;;  %v1322_v12 = vrot.slane %v32_v9, 6  ;;  %v1446_v36 = vld [vmem:[%s2063_s2 + $0x47] ss:$0 sm:$0xff] }
0x1293   :  { %v1323_v16 = vsel %vm62_vm3, %v1322_v12, %v1321_v13 }
0x1294   :  { %v1325_v19 = vsel %vm65_vm4, %v1324_v15, %v1323_v16 }
0x1295   :  { %v1327_v22 = vsel %vm68_vm5, %v1326_v18, %v1325_v19 }
0x1296   :  { %v1329_v25 = vsel %vm71_vm6, %v1328_v21, %v1327_v22 }
0x1297   :  { %v1331_v29 = vsel %vm74_vm7, %v1330_v24, %v1329_v25 }
0x1298   :  { %v1333_v31 = vsel %vm77_vm8, %v1332_v26, %v1331_v29 }
0x1303   :  { %v1044_v39 = vpop.permute.xlu1 %1043 }
0x1304   :  { %1599 = vmatmul.mubr.msk.f32.vlgmr.msra.gmra.mxu1 %vm259_vm10, %v1044_v39 }
0x1305   :  { %1613 = vmatpush3.msra.mxu1 %v1157_v38  ;;  %1620 = vmatprep.mubr.msk.f32.mxu1 %vm1697_vm1, %v1696_v0 }
0x1306   :  { %1614 = vmatprep.subr.mxu1 %v1696_v0 }
0x1307   :  { %1615 = vmatpush3.msra.mxu1 %v1156_v41 }
0x1308   :  { %1616 = vmatprep.subr.mxu1 %v1696_v0 }
0x1309   :  { %1617 = vmatpush3.msra.mxu1 %v1155_v42 }
0x130a   :  { %1618 = vmatprep.subr.mxu1 %v1696_v0 }
0x130b   :  { %1619 = vmatpush3.msra.mxu1 %v1154_v44 }
0x130c   :  { %1621 = vmatmul.mubr.msk.f32.vlgmr.msra.gmra.mxu1 %vm259_vm10, %v153_v45 }
0x13c4   :  { %v1113_v47 = vpop.f32.mrf.mxu1 }
0x13c5   :  { %v1118_v48 = vrot.slane %v1113_v47, 1 }
0x13c6   :  { %v1600_v50 = vpop.f32.mrf.mxu1 }
0x13c7   :  { %v1120_v52 = vadd.f32 %v1118_v48, %v1856_v55 }
0x13c9   :  { %1688 = vtanh.f32 %v1120_v52  ;;  %v1441_v57 = vmul.f32 -1.442695, %v1120_v52 }
0x13cb   :  { %1690 = vpow2.f32 %v1441_v57 }
0x13cc   :  { %v1991_v53 = vpop.f32.mrf.mxu1 }
0x13ce   :  { %v1622_v54 = vpop.f32.mrf.mxu1 }
0x13d6   :  { %v1689_v56 = vpop.eup %1688 }
0x13d7   :  { %1133 = vrot.lane.b32.xlu0 %v1689_v56, %s1698_s4 }
0x13d8   :  { %v1691_v51 = vpop.eup %1690 }
0x13d9   :  { %v1124_v58 = vadd.f32 1.0, %v1691_v51 }
0x13db   :  { %1692 = vrcp.f32 %v1124_v58 }
0x13e8   :  { %v1693_v59 = vpop.eup %1692 }
0x13e9   :  { %v1131_v40 = vmul.f32 %v1693_v59, %v1129_v61 }
0x1449   :  { %v1134_v34 = vpop.permute.xlu0 %1133 }
0x144a   :  { %v1136_v60 = vmul.f32 %v1693_v59, %v1134_v34 }
0x144c   :  { %1138 = vrot.lane.b32.xlu1 %v1136_v60, %s1698_s4 }
0x14be   :  { %v1139_v55 = vpop.permute.xlu1 %1138 }
0x14bf   :  { %v1141_v62 = vadd.f32 %v1139_v55, %v1131_v40 }
0x14c1   :  { %1694 = vtanh.f32 %v1141_v62 }
0x14ce   :  { %v1695_v49 = vpop.eup %1694 }
0x14cf   :  { %1144 = vrot.lane.b32.xlu0 %v1695_v49, %s1698_s4 }
0x1541   :  { %v1145_v4 = vpop.permute.xlu0 %1144 }
0x1542   :  { %v1147_v5 = vmul.f32 %v1693_v59, %v1145_v4 }
0x1544   :  { %v1152_v6 = vrot.slane %v1147_v5, %v1151_v3 }
0x1546   :  { %v1153_v7 = vsel %vm1148_vm13, %v1152_v6, %v1040_v37 }
0x1547   :  { %1165 = vrot.lane.b32.xlu1 %v1153_v7, %s1699_s5 }
0x15b9   :  { %v1166_v30 = vpop.permute.xlu1 %1165 }
0x15ba   :  { %1610 = vmatmul.mubr.msk.f32.vlgmr.msra.gmra.mxu0 %vm259_vm10, %v1166_v30 }
0x15bb   :  { %1624 = vmatpush3.msk.msra.mxu0 %vm82_vm0, %v1162_v27  ;;  %1625 = vmatprep.mubr.msk.f32.mxu0 %vm1697_vm1, %v1696_v0 }
0x15be   :  { %1626 = vmatmul.mubr.msk.f32.vlgmr.msra.gmra.mxu0 %vm79_vm9, %v1333_v31 }
0x167a   :  { %v1235_v32 = vpop.f32.mrf.mxu0 }
0x167b   :  { %v1309_v35 = vadd.f32 %v1991_v53, %v1235_v32 }
0x167c   :  { %v1611_v33 = vpop.f32.mrf.mxu0 }
0x167e   :  { %v1405_v37 = vpop.f32.mrf.mxu0 }
0x167f   :  { %v1409_v38 = vadd.f32 %v1405_v37, %v1309_v35 }
0x1680   :  { %v1627_v39 = vpop.f32.mrf.mxu0 }
0x1681   :  { %v1414_v41 = vadd.f32 %v1446_v36, %v1409_v38 }
0x1683   :  { %1416 = vst.msk [vmem:[%s2064_s3] sm:$0xff] %vm1415_vm2, %v1414_v41 }

</bundles_post_ra>
